<compile_context>
chip_gen: v6e
topology: v6e:2x2x1
jax: 0.10.0
libtpu: 0.0.40
codegen_flags: <defaults>
</compile_context>

<pallas_src>
import jax
import jax.numpy as jnp
from jax.experimental import pallas as pl
from jax.experimental.pallas import tpu as pltpu


# ----------------------------- configuration --------------------------------
CONFIG = {
    "VOCAB_SIZE": 100,
    "EMBEDDING_DIMS": 32,
    "HIDDEN_DIMS": 32,
    "NUM_CLASSES": 8,
    "SEQ_LEN": 8,
    "BATCH": 2,
}

LANES = 128  # lane-dim padding target (one full vreg width)
SUBLANES = 8


# ------------------------------- kernel -------------------------------------
def _make_kernel(B, S, C, V_PAD, PAD):
    """Single-invocation kernel: whole batch, all layers, one-hot gather."""

    def classifier_kernel(ids_ref, table_ref, w_ref, b_ref, out_ref):
        # ids_ref   : (B*S, 1) int32 token ids (VMEM)
        # table_ref : (V_PAD, PAD) f32 embedding table, zero-padded, VMEM
        # w_ref     : (4, PAD, PAD) packed [w_enc, w1, w2, w3], zero-padded
        # b_ref     : (4, PAD)      packed [b_enc, b1, b2, b3], zero-padded
        # out_ref   : (B, PAD) f32 lane-dense output (probs in lanes [0, C))

        # ---- embedding gather as one one-hot MXU matmul ----
        ids = ids_ref[...]                                           # (B*S, 1)
        vocab_iota = jax.lax.broadcasted_iota(jnp.int32, (B * S, V_PAD), 1)
        one_hot = (ids == vocab_iota).astype(jnp.float32)            # (B*S, V_PAD)
        x = jnp.dot(one_hot, table_ref[...],
                    preferred_element_type=jnp.float32)              # (B*S, PAD)

        biases = b_ref[...]                                          # (4, PAD)

        # ---- Encoder: token-wise Linear + ReLU (pad lanes stay zero) ----
        h = jnp.dot(x, w_ref[0], preferred_element_type=jnp.float32)
        h = jnp.maximum(h + biases[0:1, :], 0.0)                     # (B*S, PAD)

        # ---- mean-pool over the sequence: sublane reduction (S == 8 tile) ----
        pooled = jnp.mean(h.reshape(B, S, PAD), axis=1)              # (B, PAD)

        # ---- fc_layer: Linear -> ReLU -> Linear -> ReLU -> Linear ----
        h1 = jnp.dot(pooled, w_ref[1], preferred_element_type=jnp.float32)
        h1 = jnp.maximum(h1 + biases[1:2, :], 0.0)                   # (B, PAD)
        h2 = jnp.dot(h1, w_ref[2], preferred_element_type=jnp.float32)
        h2 = jnp.maximum(h2 + biases[2:3, :], 0.0)                   # (B, PAD)
        logits = jnp.dot(h2, w_ref[3], preferred_element_type=jnp.float32)
        logits = logits + biases[3:4, :]                             # (B, PAD)

        # ---- softmax over the valid class lanes only ----
        lane = jax.lax.broadcasted_iota(jnp.int32, (B, PAD), 1)
        valid = lane < C
        logits = jnp.where(valid, logits, -1e30)
        m = jnp.max(logits, axis=-1, keepdims=True)
        e = jnp.where(valid, jnp.exp(logits - m), 0.0)
        denom = jnp.sum(e, axis=-1, keepdims=True)
        # exact reciprocal: sum-to-1 is asserted at 1e-5 downstream
        out_ref[...] = e * pl.reciprocal(denom, approx=False)

    return classifier_kernel


# ------------------------------- wrapper -------------------------------------
def classifier_forward(token_ids, params):
    """token_ids: (B, S) int32.  Returns (B, NUM_CLASSES) float32 probs."""
    B, S = token_ids.shape
    V, E = params["embedding"].shape
    H = params["w_enc"].shape[1]
    H2 = params["w1"].shape[1]
    C = params["w3"].shape[1]
    PAD = LANES
    V_PAD = pl.cdiv(V, LANES) * LANES
    assert max(E, H, H2, C) <= PAD, "feature dims must fit within one 128-lane pad"
    assert S % SUBLANES == 0, "sublane mean-pool path requires SEQ_LEN % 8 == 0"

    def pad_mat(a):  # (r, c) -> (PAD, PAD), zero-padded
        r, c = a.shape
        return jnp.pad(a, ((0, PAD - r), (0, PAD - c)))

    def pad_bias(a):  # (1, k) -> (1, PAD)
        return jnp.pad(a, ((0, 0), (0, PAD - a.shape[1])))

    table_p = jnp.pad(params["embedding"],
                      ((0, V_PAD - V), (0, PAD - E)))                    # (V_PAD, PAD)
    w_slab = jnp.stack(
        [pad_mat(params["w_enc"]), pad_mat(params["w1"]),
         pad_mat(params["w2"]), pad_mat(params["w3"])], axis=0)          # (4, PAD, PAD)
    b_slab = jnp.concatenate(
        [pad_bias(params["b_enc"]), pad_bias(params["b1"]),
         pad_bias(params["b2"]), pad_bias(params["b3"])], axis=0)        # (4, PAD)

    ids2d = token_ids.reshape(B * S, 1).astype(jnp.int32)                # (B*S, 1)

    out = pl.pallas_call(
        _make_kernel(B, S, C, V_PAD, PAD),
        out_shape=jax.ShapeDtypeStruct((B, PAD), jnp.float32),
        in_specs=[
            pl.BlockSpec(memory_space=pltpu.MemorySpace.VMEM),   # token ids
            pl.BlockSpec(memory_space=pltpu.MemorySpace.VMEM),   # embedding table
            pl.BlockSpec(memory_space=pltpu.MemorySpace.VMEM),   # packed weights
            pl.BlockSpec(memory_space=pltpu.MemorySpace.VMEM),   # packed biases
        ],
        out_specs=pl.BlockSpec(memory_space=pltpu.MemorySpace.VMEM),
    )(ids2d, table_p, w_slab, b_slab)

    return out[:, :C]  # (B, C)


# ----------------------------- reference (pure JAX) ---------------------------
def reference_forward(token_ids, params):
    emb = jnp.take(params["embedding"], token_ids, axis=0)               # (B, S, E)
    h = jnp.einsum("bse,eh->bsh", emb, params["w_enc"]) + params["b_enc"]
    h = jnp.maximum(h, 0.0)
    pooled = jnp.mean(h, axis=1)                                          # (B, H)
    h1 = jnp.maximum(pooled @ params["w1"] + params["b1"], 0.0)
    h2 = jnp.maximum(h1 @ params["w2"] + params["b2"], 0.0)
    logits = h2 @ params["w3"] + params["b3"]
    return jax.nn.softmax(logits, axis=1)


# ----------------------------- param init ------------------------------------
def init_params(key, cfg):
    V, E, H, C = (cfg["VOCAB_SIZE"], cfg["EMBEDDING_DIMS"],
                  cfg["HIDDEN_DIMS"], cfg["NUM_CLASSES"])
    H2 = 2 * H
    ks = jax.random.split(key, 9)
    scale = 0.05
    return {
        "embedding": scale * jax.random.normal(ks[0], (V, E), jnp.float32),
        "w_enc": scale * jax.random.normal(ks[1], (E, H), jnp.float32),
        "b_enc": scale * jax.random.normal(ks[2], (1, H), jnp.float32),
        "w1": scale * jax.random.normal(ks[3], (H, H2), jnp.float32),
        "b1": scale * jax.random.normal(ks[4], (1, H2), jnp.float32),
        "w2": scale * jax.random.normal(ks[5], (H2, H2), jnp.float32),
        "b2": scale * jax.random.normal(ks[6], (1, H2), jnp.float32),
        "w3": scale * jax.random.normal(ks[7], (H2, C), jnp.float32),
        "b3": scale * jax.random.normal(ks[8], (1, C), jnp.float32),
    }


# --------------------------------- main ---------------------------------------
if __name__ == "__main__":
    cfg = CONFIG
    key = jax.random.PRNGKey(0)
    pkey, tkey = jax.random.split(key)

    params = init_params(pkey, cfg)
    token_ids = jax.random.randint(
        tkey, (cfg["BATCH"], cfg["SEQ_LEN"]), 0, cfg["VOCAB_SIZE"], dtype=jnp.int32)

    probs = jax.jit(classifier_forward)(token_ids, params)
    probs = jax.block_until_ready(probs)

    # Sanity checks.
    assert probs.shape == (cfg["BATCH"], cfg["NUM_CLASSES"])
    assert jnp.allclose(jnp.sum(probs, axis=1), 1.0, atol=1e-5)

    ref = reference_forward(token_ids, params)
    assert jnp.allclose(probs, ref, atol=1e-3, rtol=1e-3)

    print("KERNEL_OK")
</pallas_src>

<mosaic_0001>
module attributes {stable_mosaic.version = 11 : i64} {
  func.func @classifier_kernel(%arg0: memref<16x1xi32, #tpu.memory_space<vmem>>, %arg1: memref<128x128xf32, #tpu.memory_space<vmem>>, %arg2: memref<4x128x128xf32, #tpu.memory_space<vmem>>, %arg3: memref<4x128xf32, #tpu.memory_space<vmem>>, %arg4: memref<2x128xf32, #tpu.memory_space<vmem>>) attributes {dimension_semantics = [], scalar_prefetch = 0 : i64, scratch_operands = 0 : i64, tpu.core_type = #tpu.core_type<tc>} {
    %c0 = arith.constant 0 : index
    %c0_0 = arith.constant 0 : index
    %0 = vector.load %arg0[%c0, %c0_0] : memref<16x1xi32, #tpu.memory_space<vmem>>, vector<16x1xi32>
    %1 = tpu.iota {dimensions = array<i32: 1>} : vector<16x128xi32>
    %2 = vector.broadcast %0 : vector<16x1xi32> to vector<16x128xi32>
    %3 = arith.cmpi eq, %2, %1 : vector<16x128xi32>
    %4 = arith.extui %3 : vector<16x128xi1> to vector<16x128xi32>
    %5 = arith.sitofp %4 : vector<16x128xi32> to vector<16x128xf32>
    %c0_1 = arith.constant 0 : index
    %c0_2 = arith.constant 0 : index
    %6 = vector.load %arg1[%c0_1, %c0_2] : memref<128x128xf32, #tpu.memory_space<vmem>>, vector<128x128xf32>
    %cst = arith.constant dense<0.000000e+00> : vector<16x128xf32>
    %7 = tpu.matmul %5, %6, %cst {dimension_numbers = #tpu.dot_dimension_numbers<[1], [0], [0], [1], [0, 0, 1, 1], [], []>} : vector<16x128xf32>, vector<128x128xf32>, vector<16x128xf32> -> vector<16x128xf32>
    %c0_3 = arith.constant 0 : index
    %c0_4 = arith.constant 0 : index
    %8 = vector.load %arg3[%c0_3, %c0_4] : memref<4x128xf32, #tpu.memory_space<vmem>>, vector<4x128xf32>
    %c0_5 = arith.constant 0 : index
    %c0_6 = arith.constant 0 : index
    %c0_7 = arith.constant 0 : index
    %9 = vector.load %arg2[%c0_5, %c0_6, %c0_7] : memref<4x128x128xf32, #tpu.memory_space<vmem>>, vector<1x128x128xf32>
    %10 = vector.shape_cast %9 : vector<1x128x128xf32> to vector<128x128xf32>
    %cst_8 = arith.constant dense<0.000000e+00> : vector<16x128xf32>
    %11 = tpu.matmul %7, %10, %cst_8 {dimension_numbers = #tpu.dot_dimension_numbers<[1], [0], [0], [1], [0, 0, 1, 1], [], []>} : vector<16x128xf32>, vector<128x128xf32>, vector<16x128xf32> -> vector<16x128xf32>
    %12 = vector.extract_strided_slice %8 {offsets = [0, 0], sizes = [1, 128], strides = [1, 1]} : vector<4x128xf32> to vector<1x128xf32>
    %13 = vector.broadcast %12 : vector<1x128xf32> to vector<16x128xf32>
    %14 = arith.addf %11, %13 : vector<16x128xf32>
    %cst_9 = arith.constant 0.000000e+00 : f32
    %15 = vector.broadcast %cst_9 : f32 to vector<16x128xf32>
    %16 = arith.maximumf %14, %15 : vector<16x128xf32>
    %17 = vector.shape_cast %16 : vector<16x128xf32> to vector<2x8x128xf32>
    %cst_10 = arith.constant dense<0.000000e+00> : vector<2x128xf32>
    %18 = vector.multi_reduction <add>, %17, %cst_10 [1] : vector<2x8x128xf32> to vector<2x128xf32>
    %cst_11 = arith.constant 8.000000e+00 : f32
    %19 = vector.broadcast %cst_11 : f32 to vector<2x128xf32>
    %20 = arith.divf %18, %19 : vector<2x128xf32>
    %c1 = arith.constant 1 : index
    %c0_12 = arith.constant 0 : index
    %c0_13 = arith.constant 0 : index
    %21 = vector.load %arg2[%c1, %c0_12, %c0_13] : memref<4x128x128xf32, #tpu.memory_space<vmem>>, vector<1x128x128xf32>
    %22 = vector.shape_cast %21 : vector<1x128x128xf32> to vector<128x128xf32>
    %cst_14 = arith.constant dense<0.000000e+00> : vector<2x128xf32>
    %23 = tpu.matmul %20, %22, %cst_14 {dimension_numbers = #tpu.dot_dimension_numbers<[1], [0], [0], [1], [0, 0, 1, 1], [], []>} : vector<2x128xf32>, vector<128x128xf32>, vector<2x128xf32> -> vector<2x128xf32>
    %24 = vector.extract_strided_slice %8 {offsets = [1, 0], sizes = [1, 128], strides = [1, 1]} : vector<4x128xf32> to vector<1x128xf32>
    %25 = vector.broadcast %24 : vector<1x128xf32> to vector<2x128xf32>
    %26 = arith.addf %23, %25 : vector<2x128xf32>
    %cst_15 = arith.constant 0.000000e+00 : f32
    %27 = vector.broadcast %cst_15 : f32 to vector<2x128xf32>
    %28 = arith.maximumf %26, %27 : vector<2x128xf32>
    %c2 = arith.constant 2 : index
    %c0_16 = arith.constant 0 : index
    %c0_17 = arith.constant 0 : index
    %29 = vector.load %arg2[%c2, %c0_16, %c0_17] : memref<4x128x128xf32, #tpu.memory_space<vmem>>, vector<1x128x128xf32>
    %30 = vector.shape_cast %29 : vector<1x128x128xf32> to vector<128x128xf32>
    %cst_18 = arith.constant dense<0.000000e+00> : vector<2x128xf32>
    %31 = tpu.matmul %28, %30, %cst_18 {dimension_numbers = #tpu.dot_dimension_numbers<[1], [0], [0], [1], [0, 0, 1, 1], [], []>} : vector<2x128xf32>, vector<128x128xf32>, vector<2x128xf32> -> vector<2x128xf32>
    %32 = vector.extract_strided_slice %8 {offsets = [2, 0], sizes = [1, 128], strides = [1, 1]} : vector<4x128xf32> to vector<1x128xf32>
    %33 = vector.broadcast %32 : vector<1x128xf32> to vector<2x128xf32>
    %34 = arith.addf %31, %33 : vector<2x128xf32>
    %cst_19 = arith.constant 0.000000e+00 : f32
    %35 = vector.broadcast %cst_19 : f32 to vector<2x128xf32>
    %36 = arith.maximumf %34, %35 : vector<2x128xf32>
    %c3 = arith.constant 3 : index
    %c0_20 = arith.constant 0 : index
    %c0_21 = arith.constant 0 : index
    %37 = vector.load %arg2[%c3, %c0_20, %c0_21] : memref<4x128x128xf32, #tpu.memory_space<vmem>>, vector<1x128x128xf32>
    %38 = vector.shape_cast %37 : vector<1x128x128xf32> to vector<128x128xf32>
    %cst_22 = arith.constant dense<0.000000e+00> : vector<2x128xf32>
    %39 = tpu.matmul %36, %38, %cst_22 {dimension_numbers = #tpu.dot_dimension_numbers<[1], [0], [0], [1], [0, 0, 1, 1], [], []>} : vector<2x128xf32>, vector<128x128xf32>, vector<2x128xf32> -> vector<2x128xf32>
    %40 = vector.extract_strided_slice %8 {offsets = [3, 0], sizes = [1, 128], strides = [1, 1]} : vector<4x128xf32> to vector<1x128xf32>
    %41 = vector.broadcast %40 : vector<1x128xf32> to vector<2x128xf32>
    %42 = arith.addf %39, %41 : vector<2x128xf32>
    %43 = tpu.iota {dimensions = array<i32: 1>} : vector<2x128xi32>
    %c8_i32 = arith.constant 8 : i32
    %44 = vector.broadcast %c8_i32 : i32 to vector<2x128xi32>
    %45 = arith.cmpi slt, %43, %44 : vector<2x128xi32>
    %cst_23 = arith.constant -1.000000e+30 : f32
    %46 = vector.broadcast %cst_23 : f32 to vector<2x128xf32>
    %47 = arith.select %45, %42, %46 : vector<2x128xi1>, vector<2x128xf32>
    %cst_24 = arith.constant dense<0xFF800000> : vector<2xf32>
    %48 = vector.multi_reduction <maximumf>, %47, %cst_24 [1] : vector<2x128xf32> to vector<2xf32>
    %49 = vector.shape_cast %48 : vector<2xf32> to vector<2x1xf32>
    %50 = vector.broadcast %49 : vector<2x1xf32> to vector<2x128xf32>
    %51 = arith.subf %47, %50 : vector<2x128xf32>
    %52 = math.exp %51 : vector<2x128xf32>
    %cst_25 = arith.constant 0.000000e+00 : f32
    %53 = vector.broadcast %cst_25 : f32 to vector<2x128xf32>
    %54 = arith.select %45, %52, %53 : vector<2x128xi1>, vector<2x128xf32>
    %cst_26 = arith.constant dense<0.000000e+00> : vector<2xf32>
    %55 = vector.multi_reduction <add>, %54, %cst_26 [1] : vector<2x128xf32> to vector<2xf32>
    %56 = vector.shape_cast %55 : vector<2xf32> to vector<2x1xf32>
    %57 = tpu.reciprocal %56 : vector<2x1xf32> -> vector<2x1xf32>
    %58 = vector.broadcast %57 : vector<2x1xf32> to vector<2x128xf32>
    %59 = arith.mulf %54, %58 : vector<2x128xf32>
    %c0_27 = arith.constant 0 : index
    %c0_28 = arith.constant 0 : index
    %60 = vector.load %arg4[%c0_27, %c0_28] : memref<2x128xf32, #tpu.memory_space<vmem>>, vector<2x128xf32>
    tpu.vector_store %arg4[%c0_27, %c0_28], %59 {strides = array<i32>} : memref<2x128xf32, #tpu.memory_space<vmem>>, vector<2x128xf32>,
    return
  }
}

</mosaic_0001>

<bundles_post_ra>
// kernel: classifier_forward.1
= control target key start
LH: loop header
LB: loop body
LE: loop exit
PB: predicated region body
PF: predicated region fallthrough
CT: control target
= control target key end

     0   :  { %v894_v2 = vmov 0   ;;  %s1249_s0 = inlined_call_operand.vmem [shape: s32[16,1], index: 0, kind: input, shape index: {}]   ;;  %s1250_s1 = inlined_call_operand.vmem [shape: f32[128,128], index: 1, kind: input, shape index: {}]   ;;  %s1251_s2 = inlined_call_operand.vmem [shape: f32[4,128,128], index: 2, kind: input, shape index: {}]   ;;  %s1252_s3 = inlined_call_operand.vmem [shape: f32[4,128], index: 3, kind: input, shape index: {}]   ;;  %s1253_s4 = inlined_call_operand.hbm [shape: f32[2,128], index: 4, kind: output, shape index: {}]  }
   0x1   :  { %v18_v0 = vld [vmem:[%s1249_s0] sm:$0xff]  ;;  %v49_v1 = vld [vmem:[%s1250_s1 + $0x78] sm:$0xff]  ;;  %867 = vset.pattern.permute.xlu0 %v894_v2  ;;  %v48_v3 = vld [vmem:[%s1250_s1 + $0x70] sm:$0xff] }
   0x2   :  { %687 = vmatprep.subr.mxu0 %v49_v1  ;;  %23 = vperm.xlu0 %867, %v18_v0   ;;  %v47_v4 = vld [vmem:[%s1250_s1 + $0x68] sm:$0xff]  ;;  %v46_v6 = vld [vmem:[%s1250_s1 + $0x60] sm:$0xff]  ;;  %v45_v7 = vld [vmem:[%s1250_s1 + $0x58] sm:$0xff] }
   0x3   :  { %688 = vmatpush3.msra.mxu0 %v49_v1  ;;  %v19_v5 = vld [vmem:[%s1249_s0 + $0x8] sm:$0xff]  ;;  %v141_v8 = vld [vmem:[%s1251_s2 + $0x78] sm:$0xff]  ;;  %v140_v9 = vld [vmem:[%s1251_s2 + $0x70] sm:$0xff] }
   0x4   :  { %689 = vmatprep.subr.mxu0 %v48_v3  ;;  %722 = vmatprep.subr.mxu1 %v141_v8  ;;  %v44_v10 = vld [vmem:[%s1250_s1 + $0x50] sm:$0xff]  ;;  %v139_v11 = vld [vmem:[%s1251_s2 + $0x68] sm:$0xff]  ;;  %v138_v13 = vld [vmem:[%s1251_s2 + $0x60] sm:$0xff] }
   0x5   :  { %690 = vmatpush3.msra.mxu0 %v48_v3  ;;  %723 = vmatpush3.msra.mxu1 %v141_v8  ;;  %v43_v12 = vld [vmem:[%s1250_s1 + $0x48] sm:$0xff] }
   0x6   :  { %691 = vmatprep.subr.mxu0 %v47_v4  ;;  %26 = vperm.xlu0 %867, %v19_v5  }
   0x7   :  { %692 = vmatpush3.msra.mxu0 %v47_v4  ;;  %724 = vmatprep.subr.mxu1 %v140_v9 }
   0x8   :  { %693 = vmatprep.subr.mxu0 %v46_v6  ;;  %725 = vmatpush3.msra.mxu1 %v140_v9 }
   0x9   :  { %694 = vmatpush3.msra.mxu0 %v46_v6 }
   0xa   :  { %695 = vmatprep.subr.mxu0 %v45_v7 }
   0xb   :  { %696 = vmatpush3.msra.mxu0 %v45_v7 }
   0xc   :  { %9 = vsyncpa [#allocation3], 0  ;;  %697 = vmatprep.subr.mxu0 %v44_v10  ;;  %726 = vmatprep.subr.mxu1 %v139_v11  ;;  %v42_v14 = vld [vmem:[%s1250_s1 + $0x40] sm:$0xff]  ;;  %v137_v15 = vld [vmem:[%s1251_s2 + $0x58] sm:$0xff]  ;;  %v20_v33 = vlaneseq  ;;  %v895_v36 = vmov 1.0   ;;  %v896_v41 = vmov 0.0  }
   0xd   :  { %698 = vmatpush3.msra.mxu0 %v44_v10  ;;  %727 = vmatpush3.msra.mxu1 %v139_v11  ;;  %v41_v16 = vld [vmem:[%s1250_s1 + $0x38] sm:$0xff]  ;;  %v136_v17 = vld [vmem:[%s1251_s2 + $0x50] sm:$0xff]  ;;  %v135_v19 = vld [vmem:[%s1251_s2 + $0x48] sm:$0xff]  ;;  %vm897_vm2 = vmmov 0   ;;  %vm261_vm3 = vcmask 1041409   ;;  %vm520_vm5 = vcmask 1041408  }
   0xe   :  { %699 = vmatprep.subr.mxu0 %v43_v12  ;;  %728 = vmatprep.subr.mxu1 %v138_v13  ;;  %v40_v18 = vld [vmem:[%s1250_s1 + $0x30] sm:$0xff]  ;;  %v39_v20 = vld [vmem:[%s1250_s1 + $0x28] sm:$0xff]  ;;  %v134_v21 = vld [vmem:[%s1251_s2 + $0x40] sm:$0xff]  ;;  %v1021_v34 = vand.u32 127, %v20_v33  ;;  %v1154_v8 = vshrl.u32 %v20_v33, 7 }
   0xf   :  { %700 = vmatpush3.msra.mxu0 %v43_v12  ;;  %729 = vmatpush3.msra.mxu1 %v138_v13  ;;  %v38_v22 = vld [vmem:[%s1250_s1 + $0x20] sm:$0xff]  ;;  %v133_v23 = vld [vmem:[%s1251_s2 + $0x38] sm:$0xff]  ;;  %v132_v25 = vld [vmem:[%s1251_s2 + $0x30] sm:$0xff] }
  0x10   :  { %701 = vmatprep.subr.mxu0 %v42_v14  ;;  %730 = vmatprep.subr.mxu1 %v137_v15  ;;  %v37_v24 = vld [vmem:[%s1250_s1 + $0x18] sm:$0xff]  ;;  %v36_v26 = vld [vmem:[%s1250_s1 + $0x10] sm:$0xff]  ;;  %v131_v27 = vld [vmem:[%s1251_s2 + $0x28] sm:$0xff]  ;;  %v144_v9 = vsub.s32 0, %v1154_v8  ;;  %vm518_vm4 = vcmp.lt.s32.totalorder %v1021_v34, 8 }
  0x11   :  { %702 = vmatpush3.msra.mxu0 %v42_v14  ;;  %731 = vmatpush3.msra.mxu1 %v137_v15  ;;  %v35_v28 = vld [vmem:[%s1250_s1 + $0x8] sm:$0xff]  ;;  %v130_v29 = vld [vmem:[%s1251_s2 + $0x20] sm:$0xff]  ;;  %v129_v31 = vld [vmem:[%s1251_s2 + $0x18] sm:$0xff] }
  0x12   :  { %703 = vmatprep.subr.mxu0 %v41_v16  ;;  %732 = vmatprep.subr.mxu1 %v136_v17  ;;  %v34_v30 = vld [vmem:[%s1250_s1] sm:$0xff]  ;;  %v128_v32 = vld [vmem:[%s1251_s2 + $0x10] sm:$0xff]  ;;  %v127_v38 = vld [vmem:[%s1251_s2 + $0x8] sm:$0xff] }
  0x13   :  { %704 = vmatpush3.msra.mxu0 %v41_v16  ;;  %733 = vmatpush3.msra.mxu1 %v136_v17  ;;  %v126_v39 = vld [vmem:[%s1251_s2] sm:$0xff]  ;;  %v567_v40 = vld [vmem:[%s1251_s2 + $0xf8] sm:$0xff]  ;;  %v566_v42 = vld [vmem:[%s1251_s2 + $0xf0] sm:$0xff] }
  0x14   :  { %705 = vmatprep.subr.mxu0 %v40_v18  ;;  %734 = vmatprep.subr.mxu1 %v135_v19  ;;  %v565_v43 = vld [vmem:[%s1251_s2 + $0xe8] sm:$0xff]  ;;  %v564_v44 = vld [vmem:[%s1251_s2 + $0xe0] sm:$0xff]  ;;  %v563_v45 = vld [vmem:[%s1251_s2 + $0xd8] sm:$0xff] }
  0x15   :  { %706 = vmatpush3.msra.mxu0 %v40_v18  ;;  %735 = vmatpush3.msra.mxu1 %v135_v19  ;;  %v562_v48 = vld [vmem:[%s1251_s2 + $0xd0] sm:$0xff]  ;;  %v561_v49 = vld [vmem:[%s1251_s2 + $0xc8] sm:$0xff]  ;;  %v560_v50 = vld [vmem:[%s1251_s2 + $0xc0] sm:$0xff] }
  0x16   :  { %707 = vmatprep.subr.mxu0 %v39_v20  ;;  %736 = vmatprep.subr.mxu1 %v134_v21  ;;  %v559_v51 = vld [vmem:[%s1251_s2 + $0xb8] sm:$0xff]  ;;  %v558_v52 = vld [vmem:[%s1251_s2 + $0xb0] sm:$0xff]  ;;  %v557_v53 = vld [vmem:[%s1251_s2 + $0xa8] sm:$0xff] }
  0x17   :  { %708 = vmatpush3.msra.mxu0 %v39_v20  ;;  %737 = vmatpush3.msra.mxu1 %v134_v21  ;;  %v556_v54 = vld [vmem:[%s1251_s2 + $0xa0] sm:$0xff]  ;;  %v555_v55 = vld [vmem:[%s1251_s2 + $0x98] sm:$0xff]  ;;  %v554_v56 = vld [vmem:[%s1251_s2 + $0x90] sm:$0xff] }
  0x18   :  { %709 = vmatprep.subr.mxu0 %v38_v22  ;;  %738 = vmatprep.subr.mxu1 %v133_v23  ;;  %v553_v57 = vld [vmem:[%s1251_s2 + $0x88] sm:$0xff]  ;;  %v552_v58 = vld [vmem:[%s1251_s2 + $0x80] sm:$0xff]  ;;  %v583_v59 = vld [vmem:[%s1251_s2 + $0x178] sm:$0xff] }
  0x19   :  { %710 = vmatpush3.msra.mxu0 %v38_v22  ;;  %739 = vmatpush3.msra.mxu1 %v133_v23  ;;  %v582_v60 = vld [vmem:[%s1251_s2 + $0x170] sm:$0xff]  ;;  %v581_v61 = vld [vmem:[%s1251_s2 + $0x168] sm:$0xff]  ;;  %v580_v62 = vld [vmem:[%s1251_s2 + $0x160] sm:$0xff] }
  0x1a   :  { %711 = vmatprep.subr.mxu0 %v37_v24  ;;  %740 = vmatprep.subr.mxu1 %v132_v25  ;;  %v579_v63 = vld [vmem:[%s1251_s2 + $0x158] sm:$0xff]  ;;  %v578_v0 = vld [vmem:[%s1251_s2 + $0x150] sm:$0xff]  ;;  %v577_v1 = vld [vmem:[%s1251_s2 + $0x148] sm:$0xff] }
  0x1b   :  { %712 = vmatpush3.msra.mxu0 %v37_v24  ;;  %741 = vmatpush3.msra.mxu1 %v132_v25  ;;  %v576_v2 = vld [vmem:[%s1251_s2 + $0x140] sm:$0xff]  ;;  %v575_v3 = vld [vmem:[%s1251_s2 + $0x138] sm:$0xff]  ;;  %v574_v4 = vld [vmem:[%s1251_s2 + $0x130] sm:$0xff] }
  0x1c   :  { %713 = vmatprep.subr.mxu0 %v36_v26  ;;  %742 = vmatprep.subr.mxu1 %v131_v27  ;;  %v573_v5 = vld [vmem:[%s1251_s2 + $0x128] sm:$0xff]  ;;  %v572_v6 = vld [vmem:[%s1251_s2 + $0x120] sm:$0xff]  ;;  %v571_v7 = vld [vmem:[%s1251_s2 + $0x118] sm:$0xff] }
  0x1d   :  { %714 = vmatpush3.msra.mxu0 %v36_v26  ;;  %743 = vmatpush3.msra.mxu1 %v131_v27  ;;  %v1160_v10 = vld [vmem:[%s1252_s3] sm:$0xf]  ;;  %v570_v33 = vld [vmem:[%s1251_s2 + $0x110] sm:$0xff] }
  0x1e   :  { %715 = vmatprep.subr.mxu0 %v35_v28  ;;  %744 = vmatprep.subr.mxu1 %v130_v29  ;;  %v145_v11 = vrot.slane %v1160_v10, %v144_v9 }
  0x1f   :  { %716 = vmatpush3.msra.mxu0 %v35_v28  ;;  %745 = vmatpush3.msra.mxu1 %v130_v29 }
  0x20   :  { %717 = vmatprep.subr.mxu0 %v34_v30  ;;  %746 = vmatprep.subr.mxu1 %v129_v31 }
  0x21   :  { %718 = vmatpush3.msra.mxu0 %v34_v30  ;;  %747 = vmatpush3.msra.mxu1 %v129_v31 }
  0x22   :  { %748 = vmatprep.subr.mxu1 %v128_v32  ;;  %757 = vmatprep.subr.mxu0 %v896_v41 }
  0x23   :  { %749 = vmatpush3.msra.mxu1 %v128_v32 }
  0x24   :  { %750 = vmatprep.subr.mxu1 %v127_v38 }
  0x25   :  { %751 = vmatpush3.msra.mxu1 %v127_v38  ;;  %v598_v38 = vld [vmem:[%s1251_s2 + $0x1f0] sm:$0xff] }
  0x26   :  { %752 = vmatprep.subr.mxu1 %v126_v39 }
  0x27   :  { %753 = vmatpush3.msra.mxu1 %v126_v39  ;;  %v597_v39 = vld [vmem:[%s1251_s2 + $0x1e8] sm:$0xff] }
  0x28   :  { %792 = vmatprep.subr.mxu1 %v896_v41 }
  0x7d   :  { %v24_v35 = vpop.permute.xlu0 %23 }
  0x7e   :  { %vm28_vm0 = vcmp.eq.s32.totalorder %v24_v35, %v1021_v34  ;;  %v569_v35 = vld [vmem:[%s1251_s2 + $0x108] sm:$0xff] }
  0x7f   :  { %719 = vmatprep.mubr.msk.f32.mxu0 %vm28_vm0, %v895_v36 }
  0x81   :  { %v27_v37 = vpop.permute.xlu0 %26 }
  0x82   :  { %vm29_vm1 = vcmp.eq.s32.totalorder %v27_v37, %v1021_v34  ;;  %v599_v37 = vld [vmem:[%s1251_s2 + $0x1f8] sm:$0xff] }
  0x83   :  { %720 = vmatmul.mubr.msk.f32.vlgmr.msra.gmra.mxu0 %vm29_vm1, %v895_v36  ;;  %v568_v36 = vld [vmem:[%s1251_s2 + $0x100] sm:$0xff] }
  0x84   :  { %758 = vmatpush3.msra.mxu0 %v567_v40  ;;  %789 = vmatprep.mubr.msk.f32.mxu0 %vm897_vm2, %v896_v41  ;;  %v596_v40 = vld [vmem:[%s1251_s2 + $0x1e0] sm:$0xff] }
  0x85   :  { %759 = vmatprep.subr.mxu0 %v896_v41 }
  0x86   :  { %760 = vmatpush3.msra.mxu0 %v566_v42  ;;  %v595_v42 = vld [vmem:[%s1251_s2 + $0x1d8] sm:$0xff] }
  0x87   :  { %761 = vmatprep.subr.mxu0 %v896_v41 }
  0x88   :  { %762 = vmatpush3.msra.mxu0 %v565_v43  ;;  %v594_v43 = vld [vmem:[%s1251_s2 + $0x1d0] sm:$0xff] }
  0x89   :  { %763 = vmatprep.subr.mxu0 %v896_v41 }
  0x8a   :  { %764 = vmatpush3.msra.mxu0 %v564_v44  ;;  %v593_v44 = vld [vmem:[%s1251_s2 + $0x1c8] sm:$0xff] }
  0x8b   :  { %765 = vmatprep.subr.mxu0 %v896_v41 }
  0x8c   :  { %766 = vmatpush3.msra.mxu0 %v563_v45  ;;  %v592_v45 = vld [vmem:[%s1251_s2 + $0x1c0] sm:$0xff] }
  0x8d   :  { %767 = vmatprep.subr.mxu0 %v896_v41 }
  0x8e   :  { %768 = vmatpush3.msra.mxu0 %v562_v48  ;;  %v589_v48 = vld [vmem:[%s1251_s2 + $0x1a8] sm:$0xff] }
  0x8f   :  { %769 = vmatprep.subr.mxu0 %v896_v41 }
  0x90   :  { %770 = vmatpush3.msra.mxu0 %v561_v49  ;;  %v588_v49 = vld [vmem:[%s1251_s2 + $0x1a0] sm:$0xff] }
  0x91   :  { %771 = vmatprep.subr.mxu0 %v896_v41 }
  0x92   :  { %772 = vmatpush3.msra.mxu0 %v560_v50  ;;  %v587_v50 = vld [vmem:[%s1251_s2 + $0x198] sm:$0xff] }
  0x93   :  { %773 = vmatprep.subr.mxu0 %v896_v41 }
  0x94   :  { %774 = vmatpush3.msra.mxu0 %v559_v51  ;;  %v257_v51 = vsub.s32 1, %v1154_v8 }
  0x95   :  { %775 = vmatprep.subr.mxu0 %v896_v41 }
  0x96   :  { %776 = vmatpush3.msra.mxu0 %v558_v52  ;;  %v258_v52 = vrot.slane %v1160_v10, %v257_v51 }
  0x97   :  { %777 = vmatprep.subr.mxu0 %v896_v41 }
  0x98   :  { %778 = vmatpush3.msra.mxu0 %v557_v53 }
  0x99   :  { %779 = vmatprep.subr.mxu0 %v896_v41 }
  0x9a   :  { %780 = vmatpush3.msra.mxu0 %v556_v54 }
  0x9b   :  { %781 = vmatprep.subr.mxu0 %v896_v41 }
  0x9c   :  { %782 = vmatpush3.msra.mxu0 %v555_v55 }
  0x9d   :  { %783 = vmatprep.subr.mxu0 %v896_v41 }
  0x9e   :  { %784 = vmatpush3.msra.mxu0 %v554_v56 }
  0x9f   :  { %785 = vmatprep.subr.mxu0 %v896_v41 }
  0xa0   :  { %786 = vmatpush3.msra.mxu0 %v553_v57  ;;  %v586_v57 = vld [vmem:[%s1251_s2 + $0x190] sm:$0xff] }
  0xa1   :  { %787 = vmatprep.subr.mxu0 %v896_v41 }
  0xa2   :  { %788 = vmatpush3.msra.mxu0 %v552_v58  ;;  %v585_v58 = vld [vmem:[%s1251_s2 + $0x188] sm:$0xff] }
  0xa3   :  { %827 = vmatprep.subr.mxu0 %v896_v41 }
 0x143   :  { %v721_v46 = vpop.f32.mrf.mxu0 }
 0x145   :  { %v116_v47 = vpop.f32.mrf.mxu0 }
 0x146   :  { %754 = vmatprep.mubr.f32.mxu1 %v116_v47  ;;  %v590_v47 = vld [vmem:[%s1251_s2 + $0x1b0] sm:$0xff] }
 0x147   :  { %755 = vmatmul.mubr.f32.vlgmr.msra.gmra.mxu1 %v721_v46  ;;  %v591_v46 = vld [vmem:[%s1251_s2 + $0x1b8] sm:$0xff] }
 0x148   :  { %824 = vmatprep.mubr.msk.f32.mxu1 %vm897_vm2, %v896_v41  ;;  %793 = vmatpush3.msra.mxu1 %v583_v59  ;;  %v584_v59 = vld [vmem:[%s1251_s2 + $0x180] sm:$0xff]  ;;  %s898_s2 = smov [#allocation2]  }
 0x149   :  { %794 = vmatprep.subr.mxu1 %v896_v41  ;;  %s540_s13 = sshll.u32 %s898_s2, 4  ;;  %s541_s13 = int_to_ptr.vmem [resolvable:$true] %s540_s13 }
 0x14a   :  { %795 = vmatpush3.msra.mxu1 %v582_v60  ;;  %v354_v60 = vsub.s32 2, %v1154_v8  ;;  %s872_s14 = scalar_lea.vmem %s541_s13, 32  ;;  %p877_p1 = scmp.lt.s32.totalorder %s541_s13, %s541_s13 }
 0x14b   :  { %796 = vmatprep.subr.mxu1 %v896_v41  ;;  %p873_p0 = scmp.ne.s32.totalorder %s541_s13, %s872_s14  ;;  %p878_p2 = scmp.lt.s32.totalorder %s872_s14, %s872_s14 }
 0x14c   :  { %797 = vmatpush3.msra.mxu1 %v581_v61  ;;  %v355_v61 = vrot.slane %v1160_v10, %v354_v60 }
 0x14d   :  { %798 = vmatprep.subr.mxu1 %v896_v41  ;;  %p879_p3 = por %p878_p2, %p877_p1 }
 0x14e   :  { %799 = vmatpush3.msra.mxu1 %v580_v62 }
 0x14f   :  { %800 = vmatprep.subr.mxu1 %v896_v41  ;;  %p880_p4 = pnand %p879_p3, %p873_p0 }
 0x150   :  { %801 = vmatpush3.msra.mxu1 %v579_v63 }
 0x151   :  { %802 = vmatprep.subr.mxu1 %v896_v41 }
 0x152   :  { %803 = vmatpush3.msra.mxu1 %v578_v0 }
 0x153   :  { %804 = vmatprep.subr.mxu1 %v896_v41 }
 0x154   :  { %805 = vmatpush3.msra.mxu1 %v577_v1 }
 0x155   :  { %806 = vmatprep.subr.mxu1 %v896_v41 }
 0x156   :  { %807 = vmatpush3.msra.mxu1 %v576_v2  ;;  %v446_v2 = vsub.s32 3, %v1154_v8 }
 0x157   :  { %808 = vmatprep.subr.mxu1 %v896_v41 }
 0x158   :  { %809 = vmatpush3.msra.mxu1 %v575_v3  ;;  %v447_v3 = vrot.slane %v1160_v10, %v446_v2 }
 0x159   :  { %810 = vmatprep.subr.mxu1 %v896_v41 }
 0x15a   :  { %811 = vmatpush3.msra.mxu1 %v574_v4 }
 0x15b   :  { %812 = vmatprep.subr.mxu1 %v896_v41 }
 0x15c   :  { %813 = vmatpush3.msra.mxu1 %v573_v5 }
 0x15d   :  { %814 = vmatprep.subr.mxu1 %v896_v41 }
 0x15e   :  { %815 = vmatpush3.msra.mxu1 %v572_v6 }
 0x15f   :  { %816 = vmatprep.subr.mxu1 %v896_v41 }
 0x160   :  { %817 = vmatpush3.msra.mxu1 %v571_v7 }
 0x161   :  { %818 = vmatprep.subr.mxu1 %v896_v41 }
 0x162   :  { %819 = vmatpush3.msra.mxu1 %v570_v33 }
 0x163   :  { %820 = vmatprep.subr.mxu1 %v896_v41 }
 0x164   :  { %821 = vmatpush3.msra.mxu1 %v569_v35 }
 0x165   :  { %822 = vmatprep.subr.mxu1 %v896_v41 }
 0x166   :  { %823 = vmatpush3.msra.mxu1 %v568_v36 }
 0x207   :  { %v756_v12 = vpop.f32.mrf.mxu1 }
 0x208   :  { %v218_v13 = vadd.f32 %v756_v12, %v145_v11 }
 0x209   :  { %v212_v14 = vpop.f32.mrf.mxu1 }
 0x20a   :  { %v222_v15 = vmax.f32 %v218_v13, 0.0  ;;  %v213_v16 = vadd.f32 %v212_v14, %v145_v11 }
 0x20c   :  { %v229_v17 = vrot.slane %v222_v15, 4  ;;  %v221_v18 = vmax.f32 %v213_v16, 0.0 }
 0x20e   :  { %v230_v19 = vadd.f32 %v229_v17, %v222_v15  ;;  %v223_v20 = vrot.slane %v221_v18, 4 }
 0x210   :  { %v231_v21 = vrot.slane %v230_v19, 2  ;;  %v224_v22 = vadd.f32 %v223_v20, %v221_v18 }
 0x212   :  { %v232_v23 = vadd.f32 %v231_v21, %v230_v19  ;;  %v225_v24 = vrot.slane %v224_v22, 2 }
 0x214   :  { %v233_v25 = vrot.slane %v232_v23, 1  ;;  %v226_v26 = vadd.f32 %v225_v24, %v224_v22 }
 0x216   :  { %v234_v27 = vadd.f32 %v233_v25, %v232_v23  ;;  %v227_v28 = vrot.slane %v226_v26, 1 }
 0x218   :  { %v228_v29 = vadd.f32 %v227_v28, %v226_v26  ;;  %v237_v30 = vmul.f32 0.125, %v234_v27 }
 0x21a   :  { %v236_v31 = vmul.f32 0.125, %v228_v29 }
 0x21c   :  { %v262_v32 = vsel %vm261_vm3, %v237_v30, %v236_v31 }
 0x21d   :  { %790 = vmatmul.mubr.f32.vlgmr.msra.gmra.mxu0 %v262_v32 }
 0x21e   :  { %859 = vmatprep.mubr.msk.f32.mxu0 %vm897_vm2, %v896_v41  ;;  %828 = vmatpush3.msra.mxu0 %v599_v37 }
 0x21f   :  { %829 = vmatprep.subr.mxu0 %v896_v41 }
 0x220   :  { %830 = vmatpush3.msra.mxu0 %v598_v38 }
 0x221   :  { %831 = vmatprep.subr.mxu0 %v896_v41 }
 0x222   :  { %832 = vmatpush3.msra.mxu0 %v597_v39 }
 0x223   :  { %833 = vmatprep.subr.mxu0 %v896_v41 }
 0x224   :  { %834 = vmatpush3.msra.mxu0 %v596_v40 }
 0x225   :  { %835 = vmatprep.subr.mxu0 %v896_v41 }
 0x226   :  { %836 = vmatpush3.msra.mxu0 %v595_v42 }
 0x227   :  { %837 = vmatprep.subr.mxu0 %v896_v41 }
 0x228   :  { %838 = vmatpush3.msra.mxu0 %v594_v43 }
 0x229   :  { %839 = vmatprep.subr.mxu0 %v896_v41 }
 0x22a   :  { %840 = vmatpush3.msra.mxu0 %v593_v44 }
 0x22b   :  { %841 = vmatprep.subr.mxu0 %v896_v41 }
 0x22c   :  { %842 = vmatpush3.msra.mxu0 %v592_v45 }
 0x22d   :  { %843 = vmatprep.subr.mxu0 %v896_v41 }
 0x22e   :  { %844 = vmatpush3.msra.mxu0 %v591_v46 }
 0x22f   :  { %845 = vmatprep.subr.mxu0 %v896_v41 }
 0x230   :  { %846 = vmatpush3.msra.mxu0 %v590_v47 }
 0x231   :  { %847 = vmatprep.subr.mxu0 %v896_v41 }
 0x232   :  { %848 = vmatpush3.msra.mxu0 %v589_v48 }
 0x233   :  { %849 = vmatprep.subr.mxu0 %v896_v41 }
 0x234   :  { %850 = vmatpush3.msra.mxu0 %v588_v49 }
 0x235   :  { %851 = vmatprep.subr.mxu0 %v896_v41 }
 0x236   :  { %852 = vmatpush3.msra.mxu0 %v587_v50 }
 0x237   :  { %853 = vmatprep.subr.mxu0 %v896_v41 }
 0x238   :  { %854 = vmatpush3.msra.mxu0 %v586_v57 }
 0x239   :  { %855 = vmatprep.subr.mxu0 %v896_v41 }
 0x23a   :  { %856 = vmatpush3.msra.mxu0 %v585_v58 }
 0x23b   :  { %857 = vmatprep.subr.mxu0 %v896_v41 }
 0x23c   :  { %858 = vmatpush3.msra.mxu0 %v584_v59 }
 0x2dd   :  { %v330_v53 = vpop.f32.mrf.mxu0 }
 0x2de   :  { %v331_v54 = vadd.f32 %v330_v53, %v258_v52 }
 0x2df   :  { %v791_v55 = vpop.f32.mrf.mxu0 }
 0x2e0   :  { %v334_v56 = vmax.f32 %v331_v54, 0.0 }
 0x2e2   :  { %825 = vmatmul.mubr.f32.vlgmr.msra.gmra.mxu1 %v334_v56 }
 0x3a2   :  { %v422_v62 = vpop.f32.mrf.mxu1 }
 0x3a3   :  { %v423_v63 = vadd.f32 %v422_v62, %v355_v61 }
 0x3a4   :  { %v826_v0 = vpop.f32.mrf.mxu1 }
 0x3a5   :  { %v426_v1 = vmax.f32 %v423_v63, 0.0 }
 0x3a7   :  { %860 = vmatmul.mubr.f32.vlgmr.msra.gmra.mxu0 %v426_v1 }
 0x467   :  { %v514_v4 = vpop.f32.mrf.mxu0 }
 0x468   :  { %v515_v41 = vadd.f32 %v514_v4, %v447_v3 }
 0x469   :  { %v861_v5 = vpop.f32.mrf.mxu0 }
 0x46a   :  { %v519_v6 = vsel %vm518_vm4, %v515_v41, -1e+30 }
 0x46b   :  { %v521_v7 = vsel %vm520_vm5, %v519_v6, -inf }
 0x46c   :  { %522 = vmax.xlane.f32.xlu1 %v521_v7 }
 0x4f5   :  { %v523_v9 = vpop.xlane.xlu1 %522 }
 0x4f6   :  { %v524_v11 = vsub.f32 %v519_v6, %v523_v9 }
 0x4f8   :  { %v525_v12 = vmul.f32 1.442695, %v524_v11 }
 0x4fa   :  { %868 = vpow2.f32 %v525_v12 }
 0x507   :  { %v869_v13 = vpop.eup %868 }
 0x508   :  { %v527_v14 = vsel %vm518_vm4, %v869_v13, 0.0 }
 0x509   :  { %v528_v15 = vsel %vm520_vm5, %v527_v14, 0.0 }
 0x50a   :  { %529 = vadd.xlane.f32.xlu1 %v528_v15 }
 0x593   :  { %v530_v8 = vpop.xlane.xlu1 %529 }
 0x594   :  { %870 = vrcp.f32 %v530_v8 }
 0x5a1   :  { %v871_v10 = vpop.eup %870 }
 0x5a2   :  { %v532_v34 = vmul.f32 %v871_v10, %v527_v14 }
 0x5a4   :  { %533 = vst [vmem:[#allocation2] sm:$0x3] %v532_v34 }
 0x5a5   :  { %883 = shalt.err (!%p880_p4)
}
 0x5a6   :  { %543 = dma.vmem_to_hbm [thread:$0]  %s541_s13, 32, %s1253_s4, [#allocation3]  }
 0x5a7   :  { %892 = dma.done.wait [#allocation3], 32  }
 0x5a8   :  { %893 = vsyncadd [#allocation3], 4294967264 }
 0x5a9   :  { %547 = vsyncpa [#allocation3], 1 }

</bundles_post_ra>
